<compile_context>
chip_gen: v6e
topology: v6e:2x2x1
jax: 0.10.0
libtpu: 0.0.40
codegen_flags: <defaults>
</compile_context>

<pallas_src>
import functools
import math

import numpy as np
import jax
import jax.numpy as jnp
from jax.experimental import pallas as pl
from jax.experimental.pallas import tpu as pltpu


def _round_up(x, m):
    return (x + m - 1) // m * m


_VMEM_MARGIN = 4 * 1024 * 1024      # headroom for compiler-internal scratch


def _vmem_capacity_bytes():
    try:
        return int(pltpu.get_tpu_info().vmem_capacity_bytes)
    except Exception:
        return 64 * 1024 * 1024     # conservative fallback: v7x per-TC VMEM


def _vmem_footprint_bytes(n_pad, tm, tk, f, c_bytes):
    """Actual VMEM footprint of the fused kernel (no double-counting)."""
    return (2 * tm * tk * c_bytes            # S tile, double-buffered
            + 2 * n_pad * 2 * f * c_bytes    # layer-0 xwc slab (input, 2 bufs)
            + 2 * f * 2 * f * c_bytes        # [W | W_lin] slab
            + 2 * f * 4                      # bias
            + 2 * tm * f * 4                 # output tile (f32)
            + n_pad * f * c_bytes            # hidden-state scratch
            + n_pad * 2 * f * c_bytes        # hoisted H@[W|W_lin] scratch
            + tm * f * 4)                    # S-tile accumulator (f32)


def _select_tiling(n, f, c_bytes, budget, tm, tk):
    if tm is None and tk is None:
        # Prefer one (N_pad, N_pad) S block: DMA'd from HBM once for all layers
        # and every dim 128-aligned (lane-dense, no masked stores).
        n_single = _round_up(n, 128)
        if _vmem_footprint_bytes(n_single, n_single, n_single, f, c_bytes) <= budget:
            return n_single, n_single, n_single
        tm = 256
        n_pad = _round_up(n, tm)
        for cand in (2048, 1024, 512, 256):   # TODO(synk): per-generation sweep
            if n_pad % cand == 0 and \
                    _vmem_footprint_bytes(n_pad, tm, cand, f, c_bytes) <= budget:
                return n_pad, tm, cand
        return n_pad, tm, 256
    tm = 256 if tm is None else tm
    tk = tm if tk is None else tk
    n_pad = _round_up(n, math.lcm(tm, tk))
    return n_pad, tm, tk


# ----------------------------------------------------------------------------
# Fused Pallas kernel: 3 x ( h = S @ (H W) + H W_lin + b ; act(h) )
# Grid = (layer, row_tile, kcol_tile), all sequential on one core.
# ----------------------------------------------------------------------------
def _fused_gcn_kernel(s_ref, xwc0_ref, wc_ref, b_ref, o_ref,
                      h_ref, xwc_ref, acc_ref, *, tm, tk, f, n_layers):
    l = pl.program_id(0)           # layer (outer, sequential)
    r = pl.program_id(1)           # output-row tile
    k = pl.program_id(2)           # S-column (reduction) tile
    nk = pl.num_programs(2)

    # Hoisted per-layer feature matmul H_{l-1} @ [W_l | W_lin_l]: computed once
    # per layer (r == 0, k == 0) into VMEM and reused by every (r, k) tile.
    # Layer 0's slab is precomputed in the wrapper and just copied in.
    @pl.when(jnp.logical_and(r == 0, k == 0))
    def _():
        @pl.when(l == 0)
        def _():
            xwc_ref[...] = xwc0_ref[...]

        @pl.when(l > 0)
        def _():
            xwc_ref[...] = jnp.dot(
                h_ref[...], wc_ref[0],
                preferred_element_type=jnp.float32).astype(xwc_ref.dtype)

    # Message path: accumulate S_tile @ (H W) over the S-column tiles (f32 acc).
    @pl.when(k == 0)
    def _():
        acc_ref[...] = jnp.zeros_like(acc_ref)

    col0 = pl.multiple_of(k * tk, tk)
    acc_ref[...] += jnp.dot(s_ref[...], xwc_ref[pl.ds(col0, tk), :f],
                            preferred_element_type=jnp.float32)

    # Finalize this row tile on the last column tile: add node (Linear) path +
    # bias, apply the layer's activation (predicated, not jnp.where), store.
    @pl.when(k == nk - 1)
    def _():
        row0 = pl.multiple_of(r * tm, tm)
        pre = (acc_ref[...]
               + xwc_ref[pl.ds(row0, tm), f:].astype(jnp.float32)
               + b_ref[0])

        # Hidden layers: relu, written in place into the hidden-state scratch
        # (it is only read again in full at (l+1, r==0, k==0)).
        @pl.when(l < n_layers - 1)
        def _():
            h_ref[pl.ds(row0, tm), :] = jnp.maximum(pre, 0.0).astype(h_ref.dtype)

        # Last layer: sigmoid -> lane-dense output tile.  Relies on the grid
        # being sequential on one core: intermediate layers may flush stale
        # output blocks to HBM, but the last layer rewrites every block last.
        @pl.when(l == n_layers - 1)
        def _():
            o_ref[...] = jax.nn.sigmoid(pre).astype(o_ref.dtype)


def _fused_forward(s, xwc0, wc, b, *, n_pad, tm, tk, f, vmem_limit_bytes):
    n_layers = wc.shape[0]
    grid = (n_layers, n_pad // tm, n_pad // tk)
    compute_dtype = s.dtype
    c_bytes = s.dtype.itemsize

    kernel = functools.partial(_fused_gcn_kernel, tm=tm, tk=tk, f=f,
                               n_layers=n_layers)

    # Advisory cost estimate so XLA schedules the surrounding ops sensibly.
    s_streams = 1 if (tm == n_pad and tk == n_pad) else n_layers
    flops = (n_layers * 2 * n_pad * n_pad * f
             + (n_layers - 1) * 2 * n_pad * f * (2 * f))
    bytes_accessed = (s_streams * n_pad * n_pad * c_bytes
                      + n_pad * 2 * f * c_bytes
                      + n_layers * (f * 2 * f * c_bytes + f * 4)
                      + n_pad * f * 4)
    cost = pl.CostEstimate(flops=int(flops), transcendentals=int(n_pad * f),
                           bytes_accessed=int(bytes_accessed))

    return pl.pallas_call(
        kernel,
        out_shape=jax.ShapeDtypeStruct((n_pad, f), jnp.float32),
        grid_spec=pltpu.PrefetchScalarGridSpec(
            num_scalar_prefetch=0,
            grid=grid,
            in_specs=[
                pl.BlockSpec((tm, tk), lambda l, r, k: (r, k)),          # S tile
                pl.BlockSpec((n_pad, 2 * f), lambda l, r, k: (0, 0)),    # layer-0 X@[W|Wlin]
                pl.BlockSpec((1, f, 2 * f), lambda l, r, k: (l, 0, 0)),  # [W | W_lin]
                pl.BlockSpec((1, 1, f), lambda l, r, k: (l, 0, 0)),      # bias
            ],
            out_specs=pl.BlockSpec((tm, f), lambda l, r, k: (r, 0)),
            scratch_shapes=[
                pltpu.VMEM((n_pad, f), compute_dtype),      # hidden state H
                pltpu.VMEM((n_pad, 2 * f), compute_dtype),  # hoisted H@[W|W_lin]
                pltpu.VMEM((tm, f), jnp.float32),           # S-tile accumulator
            ],
        ),
        compiler_params=pltpu.CompilerParams(
            # Layer axis is sequential; row/kcol axes carry deps through the
            # shared VMEM scratches, so they must stay "arbitrary".
            # TODO(synk): un-fuse the hoisted H@[W|W_lin] / split the hidden
            # state so the row axis can be "parallel" on v7x's second core.
            dimension_semantics=("arbitrary", "arbitrary", "arbitrary"),
            vmem_limit_bytes=vmem_limit_bytes,
        ),
        cost_estimate=cost,
    )(s, xwc0, wc, b)


# ----------------------------------------------------------------------------
# Glue: dense normalized adjacency from edge_index (scatter; done in JAX)
# ----------------------------------------------------------------------------
def build_norm_adjacency(edge_index, num_nodes, padded_nodes=None,
                         dtype=jnp.float32):
    if padded_nodes is None:
        padded_nodes = num_nodes
    row, col = edge_index[0], edge_index[1]          # row = source, col = target
    out_deg = jnp.zeros((num_nodes,), dtype).at[row].add(1.0)
    in_deg = jnp.zeros((num_nodes,), dtype).at[col].add(1.0)
    out_inv_sqrt = jnp.where(out_deg > 0, out_deg ** -0.5, 0.0)
    in_inv_sqrt = jnp.where(in_deg > 0, in_deg ** -0.5, 0.0)
    norm = out_inv_sqrt[row] * in_inv_sqrt[col]      # per-edge normalization
    # S[target, source] += norm  =>  (S @ X)[i] = sum_{j->i} norm * X[j]
    s = jnp.zeros((padded_nodes, padded_nodes), dtype).at[col, row].add(norm)
    return s
    # TODO(synk): for very large sparse graphs replace the dense S matmul with
    # a scalar-prefetch (PrefetchScalarGridSpec) segment-sum over edge_index.


def _pack_params(params, f):
    """Pack per-layer (W, W_lin, b) into lane-padded slabs [L,F,2F] / [L,1,F]."""
    wcs, bs = [], []
    for (w, w_lin, b) in params:
        fi, fo = w.shape
        wc = jnp.zeros((f, 2 * f), jnp.float32)
        wc = wc.at[:fi, :fo].set(w)                  # message weight
        wc = wc.at[:fi, f:f + fo].set(w_lin)         # linear weight (transposed)
        bp = jnp.zeros((1, f), jnp.float32).at[:, :fo].set(b)
        wcs.append(wc)
        bs.append(bp)
    return jnp.stack(wcs), jnp.stack(bs)


def three_layer_directed_gcn(x, edge_index, params, *,
                             compute_dtype=jnp.bfloat16, tm=None, tk=None):
    n, in_dim = x.shape
    dims = [in_dim] + [w.shape[1] for (w, _, _) in params]
    out_dim = dims[-1]
    f = _round_up(max(dims), 128)                    # lane-pad feature dims

    c_bytes = np.dtype(compute_dtype).itemsize
    cap = _vmem_capacity_bytes()
    budget = int(0.8 * cap) - _VMEM_MARGIN
    n_pad, tm, tk = _select_tiling(n, f, c_bytes, budget, tm, tk)

    need = _vmem_footprint_bytes(n_pad, tm, tk, f, c_bytes) + _VMEM_MARGIN
    usable = int(0.9 * cap)
    if need > usable:
        raise ValueError(
            f"fused GCN kernel needs ~{need} B of VMEM (n_pad={n_pad}, tm={tm}, "
            f"tk={tk}) but only {usable} B is usable; choose smaller tiles.")
    vmem_limit = min(max(need, 32 * 1024 * 1024), usable)

    s = build_norm_adjacency(edge_index, n, n_pad, jnp.float32)
    xp = jnp.zeros((n_pad, f), jnp.float32).at[:n, :in_dim].set(
        x.astype(jnp.float32))
    wc, b = _pack_params(params, f)
    # Layer-0's hoisted feature matmul, done once in XLA: X @ [W0 | W0_lin].
    xwc0 = jnp.dot(xp, wc[0], preferred_element_type=jnp.float32)

    out = _fused_forward(s.astype(compute_dtype), xwc0.astype(compute_dtype),
                         wc.astype(compute_dtype), b,
                         n_pad=n_pad, tm=tm, tk=tk, f=f,
                         vmem_limit_bytes=vmem_limit)
    # Padded rows/cols never leak into real rows; slice them away here.
    return out[:n, :out_dim]


# ----------------------------------------------------------------------------
# Parameter init (deterministic, mirrors shapes in the PyTorch module)
# ----------------------------------------------------------------------------
def xavier_uniform(key, shape, dtype=jnp.float32):
    fan_in, fan_out = shape
    bound = (6.0 / (fan_in + fan_out)) ** 0.5
    return jax.random.uniform(key, shape, dtype, minval=-bound, maxval=bound)


def init_layer_params(key, in_dim, out_dim):
    k_w, k_lw, k_lb = jax.random.split(key, 3)
    w = xavier_uniform(k_w, (in_dim, out_dim))                 # self.weight
    bound = 1.0 / (in_dim ** 0.5)                              # nn.Linear default-ish
    w_lin = jax.random.uniform(k_lw, (in_dim, out_dim), jnp.float32,
                               minval=-bound, maxval=bound)    # linear.weight.T
    b_lin = jax.random.uniform(k_lb, (1, out_dim), jnp.float32,
                               minval=-bound, maxval=bound)    # linear.bias
    return w, w_lin, b_lin


# ----------------------------------------------------------------------------
# Pure-JAX reference for sanity checking
# ----------------------------------------------------------------------------
def reference(x, edge_index, params):
    n = x.shape[0]
    s = build_norm_adjacency(edge_index, n, dtype=x.dtype)
    h = x
    for i, (w, wl, b) in enumerate(params):
        h = s @ (h @ w) + h @ wl + b
        h = jnp.maximum(h, 0.0) if i < 2 else jax.nn.sigmoid(h)
    return h


if __name__ == "__main__":
    input_dim, hidden_dim, output_dim = 8, 32, 4

    key = jax.random.PRNGKey(0)
    k_x, k_src, k_dst, k_p1, k_p2, k_p3, k_x2, k_e2 = jax.random.split(key, 8)

    params = (
        init_layer_params(k_p1, input_dim, hidden_dim),
        init_layer_params(k_p2, hidden_dim, hidden_dim),
        init_layer_params(k_p3, hidden_dim, output_dim),
    )

    # --- small graph (single S block path): 16 nodes, 32 directed edges ------
    num_nodes, num_edges = 16, 32
    x = jax.random.normal(k_x, (num_nodes, input_dim), jnp.float32)
    src = jax.random.randint(k_src, (num_edges,), 0, num_nodes)
    dst = jax.random.randint(k_dst, (num_edges,), 0, num_nodes)
    edge_index = jnp.stack([src, dst], axis=0)                 # [2, E]
    batch = jnp.zeros((num_nodes,), jnp.int32)                 # unused by forward

    ref = jax.block_until_ready(reference(x, edge_index, params))

    out_f32 = jax.block_until_ready(
        three_layer_directed_gcn(x, edge_index, params,
                                 compute_dtype=jnp.float32))
    assert out_f32.shape == (num_nodes, output_dim)
    assert jnp.allclose(out_f32, ref, atol=1e-5, rtol=1e-5), "f32 mismatch"

    out_bf16 = jax.block_until_ready(
        three_layer_directed_gcn(x, edge_index, params,
                                 compute_dtype=jnp.bfloat16))
    assert jnp.allclose(out_bf16, ref, atol=5e-2, rtol=5e-2), "bf16 mismatch"

    # --- tiled path (R > 1 row tiles, K > 1 column tiles) --------------------
    n2, e2 = 300, 900
    x2 = jax.random.normal(k_x2, (n2, input_dim), jnp.float32)
    k_s2, k_d2 = jax.random.split(k_e2)
    edge_index2 = jnp.stack([jax.random.randint(k_s2, (e2,), 0, n2),
                             jax.random.randint(k_d2, (e2,), 0, n2)], axis=0)
    ref2 = jax.block_until_ready(reference(x2, edge_index2, params))

    out2_f32 = jax.block_until_ready(
        three_layer_directed_gcn(x2, edge_index2, params,
                                 compute_dtype=jnp.float32, tm=128, tk=128))
    assert out2_f32.shape == (n2, output_dim)
    assert jnp.allclose(out2_f32, ref2, atol=1e-4, rtol=1e-4), "tiled f32 mismatch"

    out2_bf16 = jax.block_until_ready(
        three_layer_directed_gcn(x2, edge_index2, params,
                                 compute_dtype=jnp.bfloat16, tm=128, tk=128))
    assert jnp.allclose(out2_bf16, ref2, atol=5e-2, rtol=5e-2), "tiled bf16 mismatch"

    print("KERNEL_OK")
</pallas_src>

<mosaic_0001>
module attributes {stable_mosaic.version = 11 : i64} {
  func.func @_fused_gcn_kernel(%arg0: i32, %arg1: i32, %arg2: i32, %arg3: memref<128x128xf32, #tpu.memory_space<vmem>>, %arg4: memref<128x256xf32, #tpu.memory_space<vmem>>, %arg5: memref<1x128x256xf32, #tpu.memory_space<vmem>>, %arg6: memref<1x1x128xf32, #tpu.memory_space<vmem>>, %arg7: memref<128x128xf32, #tpu.memory_space<vmem>>, %arg8: memref<128x128xf32, #tpu.memory_space<vmem>>, %arg9: memref<128x256xf32, #tpu.memory_space<vmem>>, %arg10: memref<128x128xf32, #tpu.memory_space<vmem>>) attributes {dimension_semantics = [#tpu.dimension_semantics<arbitrary>, #tpu.dimension_semantics<arbitrary>, #tpu.dimension_semantics<arbitrary>], iteration_bounds = array<i64: 3, 1, 1>, scalar_prefetch = 0 : i64, scratch_operands = 3 : i64, tpu.core_type = #tpu.core_type<tc>, window_params = [{transform_indices = @transform_0, window_bounds = array<i64: 128, 128>}, {pipeline_mode = #tpu.pipeline_mode<synchronous>, transform_indices = @transform_1, window_bounds = array<i64: 128, 256>}, {transform_indices = @transform_2, window_bounds = array<i64: 1, 128, 256>}, {transform_indices = @transform_3, window_bounds = array<i64: 1, 1, 128>}, {transform_indices = @transform_4, window_bounds = array<i64: 128, 128>}]} {
    %c0_i32 = arith.constant 0 : i32
    %0 = arith.cmpi eq, %arg1, %c0_i32 : i32
    %c0_i32_0 = arith.constant 0 : i32
    %1 = arith.cmpi eq, %arg2, %c0_i32_0 : i32
    %2 = arith.andi %0, %1 : i1
    %3 = arith.extui %2 : i1 to i32
    %c0_i32_1 = arith.constant 0 : i32
    %4 = arith.cmpi ne, %3, %c0_i32_1 : i32
    scf.if %4 {
      %c0_i32_12 = arith.constant 0 : i32
      %20 = arith.cmpi eq, %arg0, %c0_i32_12 : i32
      %21 = arith.extui %20 : i1 to i32
      %c0_i32_13 = arith.constant 0 : i32
      %22 = arith.cmpi ne, %21, %c0_i32_13 : i32
      scf.if %22 {
        %c0_16 = arith.constant 0 : index
        %c0_17 = arith.constant 0 : index
        %26 = vector.load %arg4[%c0_16, %c0_17] : memref<128x256xf32, #tpu.memory_space<vmem>>, vector<128x256xf32>
        %c0_18 = arith.constant 0 : index
        %c0_19 = arith.constant 0 : index
        %27 = vector.load %arg9[%c0_18, %c0_19] : memref<128x256xf32, #tpu.memory_space<vmem>>, vector<128x256xf32>
        tpu.vector_store %arg9[%c0_18, %c0_19], %26 {strides = array<i32>} : memref<128x256xf32, #tpu.memory_space<vmem>>, vector<128x256xf32>,
      } else {
      }
      %c0_i32_14 = arith.constant 0 : i32
      %23 = arith.cmpi sgt, %arg0, %c0_i32_14 : i32
      %24 = arith.extui %23 : i1 to i32
      %c0_i32_15 = arith.constant 0 : i32
      %25 = arith.cmpi ne, %24, %c0_i32_15 : i32
      scf.if %25 {
        %c0_16 = arith.constant 0 : index
        %c0_17 = arith.constant 0 : index
        %26 = vector.load %arg8[%c0_16, %c0_17] : memref<128x128xf32, #tpu.memory_space<vmem>>, vector<128x128xf32>
        %c0_18 = arith.constant 0 : index
        %c0_19 = arith.constant 0 : index
        %c0_20 = arith.constant 0 : index
        %27 = vector.load %arg5[%c0_18, %c0_19, %c0_20] : memref<1x128x256xf32, #tpu.memory_space<vmem>>, vector<1x128x256xf32>
        %28 = vector.shape_cast %27 : vector<1x128x256xf32> to vector<128x256xf32>
        %cst_21 = arith.constant dense<0.000000e+00> : vector<128x256xf32>
        %29 = tpu.matmul %26, %28, %cst_21 {dimension_numbers = #tpu.dot_dimension_numbers<[1], [0], [0], [1], [0, 0, 1, 1], [], []>} : vector<128x128xf32>, vector<128x256xf32>, vector<128x256xf32> -> vector<128x256xf32>
        %c0_22 = arith.constant 0 : index
        %c0_23 = arith.constant 0 : index
        %30 = vector.load %arg9[%c0_22, %c0_23] : memref<128x256xf32, #tpu.memory_space<vmem>>, vector<128x256xf32>
        tpu.vector_store %arg9[%c0_22, %c0_23], %29 {strides = array<i32>} : memref<128x256xf32, #tpu.memory_space<vmem>>, vector<128x256xf32>,
      } else {
      }
    } else {
    }
    %c0_i32_2 = arith.constant 0 : i32
    %5 = arith.cmpi eq, %arg2, %c0_i32_2 : i32
    %6 = arith.extui %5 : i1 to i32
    %c0_i32_3 = arith.constant 0 : i32
    %7 = arith.cmpi ne, %6, %c0_i32_3 : i32
    scf.if %7 {
      %cst_12 = arith.constant 0.000000e+00 : f32
      %20 = vector.broadcast %cst_12 : f32 to vector<128x128xf32>
      %c0_13 = arith.constant 0 : index
      %c0_14 = arith.constant 0 : index
      %21 = vector.load %arg10[%c0_13, %c0_14] : memref<128x128xf32, #tpu.memory_space<vmem>>, vector<128x128xf32>
      tpu.vector_store %arg10[%c0_13, %c0_14], %20 {strides = array<i32>} : memref<128x128xf32, #tpu.memory_space<vmem>>, vector<128x128xf32>,
    } else {
    }
    %c128_i32 = arith.constant 128 : i32
    %8 = arith.muli %arg2, %c128_i32 : i32
    %9 = tpu.assume_multiple %8, 128 : i32
    %c0 = arith.constant 0 : index
    %c0_4 = arith.constant 0 : index
    %10 = vector.load %arg10[%c0, %c0_4] : memref<128x128xf32, #tpu.memory_space<vmem>>, vector<128x128xf32>
    %c0_5 = arith.constant 0 : index
    %c0_6 = arith.constant 0 : index
    %11 = vector.load %arg3[%c0_5, %c0_6] : memref<128x128xf32, #tpu.memory_space<vmem>>, vector<128x128xf32>
    %12 = arith.index_cast %9 : i32 to index
    %c0_7 = arith.constant 0 : index
    %13 = vector.load %arg9[%12, %c0_7] : memref<128x256xf32, #tpu.memory_space<vmem>>, vector<128x128xf32>
    %cst = arith.constant dense<0.000000e+00> : vector<128x128xf32>
    %14 = tpu.matmul %11, %13, %cst {dimension_numbers = #tpu.dot_dimension_numbers<[1], [0], [0], [1], [0, 0, 1, 1], [], []>} : vector<128x128xf32>, vector<128x128xf32>, vector<128x128xf32> -> vector<128x128xf32>
    %15 = arith.addf %10, %14 : vector<128x128xf32>
    %c0_8 = arith.constant 0 : index
    %c0_9 = arith.constant 0 : index
    %16 = vector.load %arg10[%c0_8, %c0_9] : memref<128x128xf32, #tpu.memory_space<vmem>>, vector<128x128xf32>
    tpu.vector_store %arg10[%c0_8, %c0_9], %15 {strides = array<i32>} : memref<128x128xf32, #tpu.memory_space<vmem>>, vector<128x128xf32>,
    %c0_i32_10 = arith.constant 0 : i32
    %17 = arith.cmpi eq, %arg2, %c0_i32_10 : i32
    %18 = arith.extui %17 : i1 to i32
    %c0_i32_11 = arith.constant 0 : i32
    %19 = arith.cmpi ne, %18, %c0_i32_11 : i32
    scf.if %19 {
      %c128_i32_12 = arith.constant 128 : i32
      %20 = arith.muli %arg1, %c128_i32_12 : i32
      %21 = tpu.assume_multiple %20, 128 : i32
      %c0_13 = arith.constant 0 : index
      %c0_14 = arith.constant 0 : index
      %22 = vector.load %arg10[%c0_13, %c0_14] : memref<128x128xf32, #tpu.memory_space<vmem>>, vector<128x128xf32>
      %23 = arith.index_cast %21 : i32 to index
      %c128 = arith.constant 128 : index
      %24 = vector.load %arg9[%23, %c128] : memref<128x256xf32, #tpu.memory_space<vmem>>, vector<128x128xf32>
      %25 = arith.addf %22, %24 : vector<128x128xf32>
      %c0_15 = arith.constant 0 : index
      %c0_16 = arith.constant 0 : index
      %c0_17 = arith.constant 0 : index
      %26 = vector.load %arg6[%c0_15, %c0_16, %c0_17] : memref<1x1x128xf32, #tpu.memory_space<vmem>>, vector<1x1x128xf32>
      %27 = vector.shape_cast %26 : vector<1x1x128xf32> to vector<1x128xf32>
      %28 = vector.broadcast %27 : vector<1x128xf32> to vector<128x128xf32>
      %29 = arith.addf %25, %28 : vector<128x128xf32>
      %c2_i32 = arith.constant 2 : i32
      %30 = arith.cmpi slt, %arg0, %c2_i32 : i32
      %31 = arith.extui %30 : i1 to i32
      %c0_i32_18 = arith.constant 0 : i32
      %32 = arith.cmpi ne, %31, %c0_i32_18 : i32
      scf.if %32 {
        %cst_21 = arith.constant 0.000000e+00 : f32
        %36 = vector.broadcast %cst_21 : f32 to vector<128x128xf32>
        %37 = arith.maximumf %29, %36 : vector<128x128xf32>
        %38 = arith.index_cast %21 : i32 to index
        %c0_22 = arith.constant 0 : index
        %39 = vector.load %arg8[%38, %c0_22] : memref<128x128xf32, #tpu.memory_space<vmem>>, vector<128x128xf32>
        tpu.vector_store %arg8[%38, %c0_22], %37 {strides = array<i32>} : memref<128x128xf32, #tpu.memory_space<vmem>>, vector<128x128xf32>,
      } else {
      }
      %c2_i32_19 = arith.constant 2 : i32
      %33 = arith.cmpi eq, %arg0, %c2_i32_19 : i32
      %34 = arith.extui %33 : i1 to i32
      %c0_i32_20 = arith.constant 0 : i32
      %35 = arith.cmpi ne, %34, %c0_i32_20 : i32
      scf.if %35 {
        %36 = arith.negf %29 : vector<128x128xf32>
        %37 = math.exp %36 : vector<128x128xf32>
        %cst_21 = arith.constant 1.000000e+00 : f32
        %38 = vector.broadcast %cst_21 : f32 to vector<128x128xf32>
        %39 = arith.addf %38, %37 : vector<128x128xf32>
        %40 = arith.divf %38, %39 : vector<128x128xf32>
        %c0_22 = arith.constant 0 : index
        %c0_23 = arith.constant 0 : index
        %41 = vector.load %arg7[%c0_22, %c0_23] : memref<128x128xf32, #tpu.memory_space<vmem>>, vector<128x128xf32>
        tpu.vector_store %arg7[%c0_22, %c0_23], %40 {strides = array<i32>} : memref<128x128xf32, #tpu.memory_space<vmem>>, vector<128x128xf32>,
      } else {
      }
    } else {
    }
    return
  }
  func.func @transform_0(%arg0: i32, %arg1: i32, %arg2: i32) -> (i32, i32) {
    %c0_i32 = arith.constant 0 : i32
    return %arg1, %arg2 : i32, i32
  }
  func.func @transform_1(%arg0: i32, %arg1: i32, %arg2: i32) -> (i32, i32) {
    %c0_i32 = arith.constant 0 : i32
    %c0_i32_0 = arith.constant 0 : i32
    %c0_i32_1 = arith.constant 0 : i32
    return %c0_i32, %c0_i32_0 : i32, i32
  }
  func.func @transform_2(%arg0: i32, %arg1: i32, %arg2: i32) -> (i32, i32, i32) {
    %c0_i32 = arith.constant 0 : i32
    %c0_i32_0 = arith.constant 0 : i32
    %c0_i32_1 = arith.constant 0 : i32
    return %arg0, %c0_i32, %c0_i32_0 : i32, i32, i32
  }
  func.func @transform_3(%arg0: i32, %arg1: i32, %arg2: i32) -> (i32, i32, i32) {
    %c0_i32 = arith.constant 0 : i32
    %c0_i32_0 = arith.constant 0 : i32
    %c0_i32_1 = arith.constant 0 : i32
    return %arg0, %c0_i32, %c0_i32_0 : i32, i32, i32
  }
  func.func @transform_4(%arg0: i32, %arg1: i32, %arg2: i32) -> (i32, i32) {
    %c0_i32 = arith.constant 0 : i32
    %c0_i32_0 = arith.constant 0 : i32
    return %arg1, %c0_i32 : i32, i32
  }
}

</mosaic_0001>

<bundles_post_ra>
// kernel: tpu_custom_call.1
= control target key start
LH: loop header
LB: loop body
LE: loop exit
PB: predicated region body
PF: predicated region fallthrough
CT: control target
= control target key end

     0   :  { %9 = vsyncpa [#allocation6], 0  ;;  %s2003_s0 = inlined_call_operand.hbm [shape: f32[128,128], index: 0, kind: input, shape index: {}]   ;;  %s2004_s1 = inlined_call_operand.hbm [shape: f32[128,256], index: 1, kind: input, shape index: {}]   ;;  %s2005_s2 = inlined_call_operand.hbm [shape: f32[3,128,256], index: 2, kind: input, shape index: {}]   ;;  %s2006_s3 = inlined_call_operand.vmem [shape: f32[3,1,128], index: 3, kind: input, shape index: {}]   ;;  %s2007_s4 = inlined_call_operand.hbm [shape: f32[128,128], index: 4, kind: output, shape index: {}]  }
   0x1   :  { %10 = vsyncpa [#allocation9], 0 }
   0x2   :  { %11 = vsyncpa [#allocation7], 0  ;;  %s1746_s15 = smov 0   ;;  %s1748_s16 = smov 0  }
   0x3   :  { %s1750_s17 = smov 0   ;;  %s1752_s18 = smov 0  }
   0x4   :  { %s1754_s19 = smov 0   ;;  %s1756_s20 = smov 0  }
   0x5 LB: > { %s1775_s21 = sadd.s32 4294967295, %s1708_s20   ;;  %p99_p0 = scmp.ne.s32.totalorder %s1696_s17, %s1692_s16  ;;  %s1708_s20 = sphi %s1756_s20, %s17_s20   ;;  %s1704_s19 = sphi %s1754_s19, %s2023_s19   ;;  %s1700_s18 = sphi %s1752_s18, %s2022_s18   ;;  %s1696_s17 = sphi %s1750_s17, %s2021_s17   ;;  %s1692_s16 = sphi %s1748_s16, %s2020_s16   ;;  %s1688_s15 = sphi %s1746_s15, %s2019_s15  }
   0x6   : > { %p100_p1 = scmp.eq.s32.totalorder %s1708_s20, 0  ;;  %p105_p2 = scmp.ne.s32.totalorder %s1692_s16, %s1688_s15 }
   0x7   : > { %p2008_p3 = scmp.eq.s32.totalorder %s1775_s21, 0  ;;  %p1199_p4 = scmp.ge.s32.totalorder %s1708_s20, 1 }
   0x8   : > { %p101_p5 = por %p100_p1, %p99_p0  ;;  %p168_p6 = scmp.lt.s32.totalorder %s1708_s20, 4 }
   0x9   : > { %p1786_p7 = por %p2008_p3, %p105_p2  ;;  %s1710_s24 = smov [#allocation5]  }
   0xa   : > { %p1790_p8 = pnand %p1199_p4, %p168_p6  ;;  %s184_s25 = sshll.u32 %s1710_s24, 4  ;;  %s185_s25 = int_to_ptr.vmem [resolvable:$true] %s184_s25 }
   0xb   : > { %p1415_p11 = scmp.lt.s32.totalorder %s1708_s20, 3  ;;  %s1553_s28 = scalar_lea.vmem %s185_s25, 2048 }
   0xc   : > { %p1402_p9 = pneg %p1790_p8  ;;  %p1554_p0 = scmp.ne.s32.totalorder %s185_s25, %s1553_s28 }
   0xd   : > { %p1803_p12 = pnand %p1415_p11, %p101_p5  ;;  %p1561_p4 = scmp.lt.s32.totalorder %s185_s25, %s185_s25 }
   0xe   : > { %p1798_p10 = pnand %p1402_p9, %p2008_p3  ;;  %p1562_p6 = scmp.lt.s32.totalorder %s1553_s28, %s1553_s28 }
  0x10   : > { %p1544_p13 = pneg %p1798_p10  ;;  %p1563_p9 = por %p1562_p6, %p1561_p4 }
  0x12   : > { %p1556_p1 = pnand %p1554_p0, %p1544_p13 }
  0x14   : > { %p1557_p2 = pneg %p1556_p1 }
  0x16   : > { %p1564_p3 = pnand %p1563_p9, %p1557_p2 }
  0x18   : > { %1567 = shalt.err (!%p1564_p3)
}
  0x19   : > { %s1711_s29 = smov 128   ;;  %s1712_s30 = smov 8  }
  0x1a   : > { %1405 = dma.hbm_to_vmem [thread:$0]  (!%p1798_p10), %s2003_s0, 2048, %s185_s25, [#allocation6], %s1711_s29, %s1711_s29, %s1712_s30  }
  0x1b   : > { %s1713_s7 = smov [#allocation8]  }
  0x1c   : > { %s197_s8 = sshll.u32 %s1713_s7, 4  ;;  %s198_s8 = int_to_ptr.vmem [resolvable:$true] %s197_s8 }
  0x1d   : > { %s1579_s9 = scalar_lea.vmem %s198_s8, 4096  ;;  %p1587_p1 = scmp.lt.s32.totalorder %s198_s8, %s198_s8 }
  0x1e   : > { %p1580_p5 = scmp.ne.s32.totalorder %s198_s8, %s1579_s9  ;;  %p1588_p3 = scmp.lt.s32.totalorder %s1579_s9, %s1579_s9 }
  0x20   : > { %p1582_p11 = pnand %p1580_p5, %p1544_p13  ;;  %p1589_p2 = por %p1588_p3, %p1587_p1 }
  0x22   : > { %p1583_p0 = pneg %p1582_p11 }
  0x24   : > { %p1590_p4 = pnand %p1589_p2, %p1583_p0 }
  0x26   : > { %1593 = shalt.err (!%p1590_p4)
}
  0x27   : > { %s1714_s10 = smov 256   ;;  %s1715_s11 = smov 16  }
  0x28   : > { %1408 = dma.hbm_to_vmem [thread:$0]  (!%p1798_p10), %s2004_s1, 4096, %s198_s8, [#allocation9], %s1714_s10, %s1714_s10, %s1715_s11  }
  0x29   : > { %s211_s15 = sand.u32 1, %s1708_s20   ;;  %s36_s24 = sadd.s32 1, %s1704_s19 }
  0x2a   : > { %p38_p13 = scmp.ge.s32.totalorder %s36_s24, 3  ;;  %s213_s25 = sand.u32 1, %s1696_s17  }
  0x2b   : > { %s1203_s28 = sshll.u32 %s213_s25, 8  ;;  %s1235_s29 = sshll.u32 %s1704_s19, 12 }
  0x2c   : > { %s2025_s24 = smov (%p38_p13, %s36_s24), 0  ;;  %s221_s26 = scalar_lea.hbm %s2005_s2, %s1235_s29 }
  0x2d   : > { %s89_s6 = ssub.s32 %s1704_s19, %s2025_s24  ;;  %s215_s7 = scalar_lea.vmem [#allocation10], %s1203_s28 }
  0x2e   : > { %s222_s9 = sshll.u32 %s215_s7, 4  ;;  %p1840_p6 = scmp.eq.s32.totalorder %s89_s6, 0  ;;  %s223_s9 = int_to_ptr.vmem [resolvable:$true] %s222_s9 }
  0x2f   : > { %s212_s12 = scalar_lea.sflag [#allocation6], %s211_s15  ;;  %p1596_p10 = pneg %p1803_p12 }
  0x30   : > { %s1607_s13 = scalar_lea.vmem %s223_s9, 4096  ;;  %s1716_s25 = smov [#allocation10]  }
  0x31   : > { %p1608_p9 = scmp.ne.s32.totalorder %s223_s9, %s1607_s13  ;;  %s1612_s14 = sshll.u32 %s1716_s25, 4  ;;  %s1613_s14 = int_to_ptr.vmem [resolvable:$false] %s1612_s14 }
  0x32   : > { %s1614_s30 = scalar_lea.vmem %s1613_s14, 8192  ;;  %p1615_p0 = scmp.lt.s32.totalorder %s223_s9, %s1613_s14 }
  0x33   : > { %p1610_p5 = pnand %p1608_p9, %p1596_p10  ;;  %p1616_p1 = scmp.lt.s32.totalorder %s1614_s30, %s1607_s13 }
  0x35   : > { %p1611_p11 = pneg %p1610_p5  ;;  %p1617_p3 = por %p1616_p1, %p1615_p0 }
  0x37   : > { %p1618_p2 = pnand %p1617_p3, %p1611_p11 }
  0x39   : > { %1621 = shalt.err (!%p1618_p2)
}
  0x3a   : > { %1412 = dma.hbm_to_vmem [thread:$0]  (!%p1803_p12), %s221_s26, 4096, %s223_s9, %s212_s12, %s1714_s10, %s1714_s10, %s1715_s11  }
  0x3b   : > { %s2014_s15 = sadd.s32 1, %s1696_s17  ;;  %240 = sbr.rel (%p1790_p8) target bundleno = 691 (0x2b3), region = 36 }
  0x3c   : > { %s1856_s28 = scalar_select %p1840_p6, %s1696_s17, %s2014_s15  }
  0x3d   : > { %p2015_p4 = scmp.eq.s32.totalorder (!%p1790_p8), %s1775_s21, 0 }
  0x40   : > { %1671 = dma.done.wait (%p2015_p4), [#allocation6], 2048   ;;  %p2016_p13 = pmov %p2015_p4 }
  0x41   : > { %p2017_p10 = pmov %p2015_p4 }
  0x42   : > { %1673 = vsyncadd (%p2016_p13), [#allocation6], 4294965248 }
  0x43   : > { %1675 = dma.done.wait (%p2017_p10), [#allocation9], 4096   ;;  %p2018_p9 = pmov %p2015_p4 }
  0x44   : > { %s250_s27 = sand.u32 1, %s1775_s21   ;;  %s252_s10 = sand.u32 1, %s1692_s16  }
  0x45   : > { %1677 = vsyncadd (%p2018_p9), [#allocation9], 4294963200  ;;  %s1209_s11 = sshll.u32 %s252_s10, 8  ;;  %s251_s23 = scalar_lea.sflag [#allocation6], %s250_s27 }
  0x46   : > { %s1870_s14 = scalar_lea.vmem [#allocation10], %s1209_s11 }
  0x47   : > { %1679 = dma.done.wait (%p1786_p7), %s251_s23, 4096  }
  0x48   : > { %1681 = vsyncadd (%p1786_p7), %s251_s23, 4294963200  ;;  %p278_p8 = scmp.lt.s32.totalorder %s1700_s18, 2  ;;  %p1210_p12 = scmp.ne.s32.totalorder %s1700_s18, 0 }
  0x4a   : > { %s1878_s29 = scalar_select %p278_p8, %s1700_s18, 2 }
  0x4b   : > { %291 = sbr.rel (%p1210_p12) target bundleno = 97 (0x61), region = 56 }
  0x4c   : > { %s280_s6 = scalar_lea.vmem %s2006_s3, %s1878_s29 }
  0x50   : > { %v292_v0 = vld [vmem:[#allocation8] sm:$0xff]  ;;  %v293_v1 = vld [vmem:[#allocation8 + $0x8] sm:$0xff]  ;;  %v294_v2 = vld [vmem:[#allocation8 + $0x10] sm:$0xff] }
  0x51   : > { %324 = vst [vmem:[#allocation3 + $0xa8] sm:$0xff] %v292_v0  ;;  %325 = vst [vmem:[#allocation3 + $0x68] sm:$0xff] %v293_v1  ;;  %v295_v3 = vld [vmem:[#allocation8 + $0x18] sm:$0xff]  ;;  %v296_v4 = vld [vmem:[#allocation8 + $0x20] sm:$0xff] }
  0x52   : > { %326 = vst [vmem:[#allocation3 + $0x10] sm:$0xff] %v294_v2  ;;  %v297_v5 = vld [vmem:[#allocation8 + $0x28] sm:$0xff]  ;;  %327 = vst [vmem:[#allocation3 + $0xc0] sm:$0xff] %v295_v3  ;;  %v298_v6 = vld [vmem:[#allocation8 + $0x30] sm:$0xff] }
  0x53   : > { %328 = vst [vmem:[#allocation3 + $0xc8] sm:$0xff] %v296_v4  ;;  %329 = vst [vmem:[#allocation3 + $0xb0] sm:$0xff] %v297_v5  ;;  %v299_v7 = vld [vmem:[#allocation8 + $0x38] sm:$0xff]  ;;  %v300_v8 = vld [vmem:[#allocation8 + $0x40] sm:$0xff] }
  0x54   : > { %330 = vst [vmem:[#allocation3 + $0x70] sm:$0xff] %v298_v6  ;;  %331 = vst [vmem:[#allocation3 + $0x38] sm:$0xff] %v299_v7  ;;  %v301_v9 = vld [vmem:[#allocation8 + $0x48] sm:$0xff]  ;;  %v302_v10 = vld [vmem:[#allocation8 + $0x50] sm:$0xff] }
  0x55   : > { %332 = vst [vmem:[#allocation3 + $0x48] sm:$0xff] %v300_v8  ;;  %v303_v11 = vld [vmem:[#allocation8 + $0x58] sm:$0xff]  ;;  %333 = vst [vmem:[#allocation3 + $0xf8] sm:$0xff] %v301_v9  ;;  %v304_v12 = vld [vmem:[#allocation8 + $0x60] sm:$0xff] }
  0x56   : > { %334 = vst [vmem:[#allocation3 + $0x78] sm:$0xff] %v302_v10  ;;  %335 = vst [vmem:[#allocation3 + $0x88] sm:$0xff] %v303_v11  ;;  %v305_v13 = vld [vmem:[#allocation8 + $0x68] sm:$0xff]  ;;  %v306_v14 = vld [vmem:[#allocation8 + $0x70] sm:$0xff] }
  0x57   : > { %336 = vst [vmem:[#allocation3 + $0xf0] sm:$0xff] %v304_v12  ;;  %337 = vst [vmem:[#allocation3 + $0x18] sm:$0xff] %v305_v13  ;;  %v307_v15 = vld [vmem:[#allocation8 + $0x78] sm:$0xff]  ;;  %v308_v16 = vld [vmem:[#allocation8 + $0x80] sm:$0xff] }
  0x58   : > { %338 = vst [vmem:[#allocation3 + $0x30] sm:$0xff] %v306_v14  ;;  %v309_v17 = vld [vmem:[#allocation8 + $0x88] sm:$0xff]  ;;  %339 = vst [vmem:[#allocation3 + $0x50] sm:$0xff] %v307_v15  ;;  %v310_v18 = vld [vmem:[#allocation8 + $0x90] sm:$0xff] }
  0x59   : > { %340 = vst [vmem:[#allocation3 + $0xb8] sm:$0xff] %v308_v16  ;;  %341 = vst [vmem:[#allocation3 + $0xd0] sm:$0xff] %v309_v17  ;;  %v311_v19 = vld [vmem:[#allocation8 + $0x98] sm:$0xff]  ;;  %v312_v20 = vld [vmem:[#allocation8 + $0xa0] sm:$0xff] }
  0x5a   : > { %342 = vst [vmem:[#allocation3 + $0xd8] sm:$0xff] %v310_v18  ;;  %343 = vst [vmem:[#allocation3 + $0x58] sm:$0xff] %v311_v19  ;;  %v313_v21 = vld [vmem:[#allocation8 + $0xa8] sm:$0xff]  ;;  %v314_v22 = vld [vmem:[#allocation8 + $0xb0] sm:$0xff] }
  0x5b   : > { %344 = vst [vmem:[#allocation3 + $0x80] sm:$0xff] %v312_v20  ;;  %v315_v23 = vld [vmem:[#allocation8 + $0xb8] sm:$0xff]  ;;  %345 = vst [vmem:[#allocation3 + $0x40] sm:$0xff] %v313_v21  ;;  %v316_v24 = vld [vmem:[#allocation8 + $0xc0] sm:$0xff] }
  0x5c   : > { %346 = vst [vmem:[#allocation3 + $0x28] sm:$0xff] %v314_v22  ;;  %347 = vst [vmem:[#allocation3] sm:$0xff] %v315_v23  ;;  %v317_v25 = vld [vmem:[#allocation8 + $0xc8] sm:$0xff]  ;;  %v318_v26 = vld [vmem:[#allocation8 + $0xd0] sm:$0xff] }
  0x5d   : > { %348 = vst [vmem:[#allocation3 + $0x90] sm:$0xff] %v316_v24  ;;  %349 = vst [vmem:[#allocation3 + $0xe8] sm:$0xff] %v317_v25  ;;  %v319_v27 = vld [vmem:[#allocation8 + $0xd8] sm:$0xff]  ;;  %v320_v28 = vld [vmem:[#allocation8 + $0xe0] sm:$0xff] }
  0x5e   : > { %350 = vst [vmem:[#allocation3 + $0xa0] sm:$0xff] %v318_v26  ;;  %v321_v29 = vld [vmem:[#allocation8 + $0xe8] sm:$0xff]  ;;  %351 = vst [vmem:[#allocation3 + $0x20] sm:$0xff] %v319_v27  ;;  %v322_v30 = vld [vmem:[#allocation8 + $0xf0] sm:$0xff] }
  0x5f   : > { %352 = vst [vmem:[#allocation3 + $0x8] sm:$0xff] %v320_v28  ;;  %353 = vst [vmem:[#allocation3 + $0xe0] sm:$0xff] %v321_v29  ;;  %v323_v31 = vld [vmem:[#allocation8 + $0xf8] sm:$0xff] }
  0x60   : > { %354 = vst [vmem:[#allocation3 + $0x60] sm:$0xff] %v322_v30  ;;  %355 = vst [vmem:[#allocation3 + $0x98] sm:$0xff] %v323_v31 }
  0x61 PF: > { %p1211_p7 = scmp.le.s32.totalorder %s1700_s18, 0 }
  0x63   : > { %359 = sbr.rel (%p1211_p7) target bundleno = 362 (0x16a), region = 60 }
  0x68   : > { %v407_v32 = vld [vmem:[%s1870_s14 + $0xf8] sm:$0xff]  ;;  %v406_v33 = vld [vmem:[%s1870_s14 + $0xf0] sm:$0xff]  ;;  %v405_v34 = vld [vmem:[%s1870_s14 + $0xe8] sm:$0xff]  ;;  %v1717_v2 = vmov 0.0  }
  0x69   : > { %408 = vmatprep.subr.mxu0 %v407_v32  ;;  %1324 = vmatprep.subr.mxu1 %v407_v32  ;;  %v404_v35 = vld [vmem:[%s1870_s14 + $0xe0] sm:$0xff]  ;;  %v403_v36 = vld [vmem:[%s1870_s14 + $0xd8] sm:$0xff]  ;;  %v402_v37 = vld [vmem:[%s1870_s14 + $0xd0] sm:$0xff] }
  0x6a   : > { %409 = vmatpush1.msra.mxu0 %v406_v33  ;;  %1340 = vmatpush1.msra.mxu1 %v406_v33  ;;  %v401_v38 = vld [vmem:[%s1870_s14 + $0xc8] sm:$0xff]  ;;  %v400_v39 = vld [vmem:[%s1870_s14 + $0xc0] sm:$0xff]  ;;  %v399_v40 = vld [vmem:[%s1870_s14 + $0xb8] sm:$0xff] }
  0x6b   : > { %410 = vmatprep.subr.mxu0 %v405_v34  ;;  %1325 = vmatprep.subr.mxu1 %v405_v34  ;;  %v398_v41 = vld [vmem:[%s1870_s14 + $0xb0] sm:$0xff]  ;;  %v397_v42 = vld [vmem:[%s1870_s14 + $0xa8] sm:$0xff]  ;;  %v396_v43 = vld [vmem:[%s1870_s14 + $0xa0] sm:$0xff] }
  0x6c   : > { %411 = vmatpush1.msra.mxu0 %v404_v35  ;;  %1341 = vmatpush1.msra.mxu1 %v404_v35  ;;  %v395_v44 = vld [vmem:[%s1870_s14 + $0x98] sm:$0xff]  ;;  %v394_v45 = vld [vmem:[%s1870_s14 + $0x90] sm:$0xff]  ;;  %v393_v46 = vld [vmem:[%s1870_s14 + $0x88] sm:$0xff] }
  0x6d   : > { %412 = vmatprep.subr.mxu0 %v403_v36  ;;  %1326 = vmatprep.subr.mxu1 %v403_v36  ;;  %v392_v47 = vld [vmem:[%s1870_s14 + $0x80] sm:$0xff]  ;;  %v391_v48 = vld [vmem:[%s1870_s14 + $0x78] sm:$0xff]  ;;  %v390_v49 = vld [vmem:[%s1870_s14 + $0x70] sm:$0xff] }
  0x6e   : > { %413 = vmatpush1.msra.mxu0 %v402_v37  ;;  %1342 = vmatpush1.msra.mxu1 %v402_v37  ;;  %v389_v50 = vld [vmem:[%s1870_s14 + $0x68] sm:$0xff]  ;;  %v388_v51 = vld [vmem:[%s1870_s14 + $0x60] sm:$0xff]  ;;  %v387_v52 = vld [vmem:[%s1870_s14 + $0x58] sm:$0xff] }
  0x6f   : > { %414 = vmatprep.subr.mxu0 %v401_v38  ;;  %1327 = vmatprep.subr.mxu1 %v401_v38  ;;  %v386_v53 = vld [vmem:[%s1870_s14 + $0x50] sm:$0xff]  ;;  %v385_v54 = vld [vmem:[%s1870_s14 + $0x48] sm:$0xff]  ;;  %v384_v55 = vld [vmem:[%s1870_s14 + $0x40] sm:$0xff] }
  0x70   : > { %415 = vmatpush1.msra.mxu0 %v400_v39  ;;  %1343 = vmatpush1.msra.mxu1 %v400_v39  ;;  %v383_v56 = vld [vmem:[%s1870_s14 + $0x38] sm:$0xff]  ;;  %v382_v57 = vld [vmem:[%s1870_s14 + $0x30] sm:$0xff]  ;;  %v381_v58 = vld [vmem:[%s1870_s14 + $0x28] sm:$0xff] }
  0x71   : > { %416 = vmatprep.subr.mxu0 %v399_v40  ;;  %1328 = vmatprep.subr.mxu1 %v399_v40  ;;  %v380_v59 = vld [vmem:[%s1870_s14 + $0x20] sm:$0xff]  ;;  %v379_v60 = vld [vmem:[%s1870_s14 + $0x18] sm:$0xff]  ;;  %v378_v61 = vld [vmem:[%s1870_s14 + $0x10] sm:$0xff] }
  0x72   : > { %417 = vmatpush1.msra.mxu0 %v398_v41  ;;  %1344 = vmatpush1.msra.mxu1 %v398_v41  ;;  %v377_v62 = vld [vmem:[%s1870_s14 + $0x8] sm:$0xff]  ;;  %v376_v63 = vld [vmem:[%s1870_s14] sm:$0xff]  ;;  %v360_v0 = vld [vmem:[#allocation2 + $0x30] sm:$0xff] }
  0x73   : > { %418 = vmatprep.subr.mxu0 %v397_v42  ;;  %1329 = vmatprep.subr.mxu1 %v397_v42  ;;  %v368_v1 = vld [vmem:[#allocation2 + $0x40] sm:$0xff]  ;;  %v362_v5 = vld [vmem:[#allocation2 + $0x58] sm:$0xff]  ;;  %v370_v6 = vld [vmem:[#allocation2 + $0x10] sm:$0xff] }
  0x74   : > { %419 = vmatpush1.msra.mxu0 %v396_v43  ;;  %1345 = vmatpush1.msra.mxu1 %v396_v43  ;;  %v361_v3 = vld [vmem:[#allocation2] sm:$0xff]  ;;  %v363_v7 = vld [vmem:[#allocation2 + $0x18] sm:$0xff]  ;;  %v364_v9 = vld [vmem:[#allocation2 + $0x50] sm:$0xff] }
  0x75   : > { %420 = vmatprep.subr.mxu0 %v395_v44  ;;  %1330 = vmatprep.subr.mxu1 %v395_v44  ;;  %v369_v4 = vld [vmem:[#allocation2 + $0x20] sm:$0xff]  ;;  %v371_v8 = vld [vmem:[#allocation2 + $0x38] sm:$0xff]  ;;  %v365_v11 = vld [vmem:[#allocation2 + $0x68] sm:$0xff] }
  0x76   : > { %421 = vmatpush1.msra.mxu0 %v394_v45  ;;  %1346 = vmatpush1.msra.mxu1 %v394_v45  ;;  %v372_v10 = vld [vmem:[#allocation2 + $0x60] sm:$0xff]  ;;  %v373_v12 = vld [vmem:[#allocation2 + $0x70] sm:$0xff]  ;;  %v366_v13 = vld [vmem:[#allocation2 + $0x8] sm:$0xff] }
  0x77   : > { %422 = vmatprep.subr.mxu0 %v393_v46  ;;  %1331 = vmatprep.subr.mxu1 %v393_v46  ;;  %v374_v14 = vld [vmem:[#allocation2 + $0x78] sm:$0xff]  ;;  %v367_v15 = vld [vmem:[#allocation2 + $0x48] sm:$0xff] }
  0x78   : > { %423 = vmatpush1.msra.mxu0 %v392_v47  ;;  %1347 = vmatpush1.msra.mxu1 %v392_v47  ;;  %v375_v16 = vld [vmem:[#allocation2 + $0x28] sm:$0xff] }
  0x79   : > { %424 = vmatprep.subr.mxu0 %v391_v48  ;;  %1332 = vmatprep.subr.mxu1 %v391_v48 }
  0x7a   : > { %425 = vmatpush1.msra.mxu0 %v390_v49  ;;  %1348 = vmatpush1.msra.mxu1 %v390_v49 }
  0x7b   : > { %426 = vmatprep.subr.mxu0 %v389_v50  ;;  %1333 = vmatprep.subr.mxu1 %v389_v50 }
  0x7c   : > { %427 = vmatpush1.msra.mxu0 %v388_v51  ;;  %1349 = vmatpush1.msra.mxu1 %v388_v51 }
  0x7d   : > { %428 = vmatprep.subr.mxu0 %v387_v52  ;;  %1334 = vmatprep.subr.mxu1 %v387_v52 }
  0x7e   : > { %429 = vmatpush1.msra.mxu0 %v386_v53  ;;  %1350 = vmatpush1.msra.mxu1 %v386_v53 }
  0x7f   : > { %430 = vmatprep.subr.mxu0 %v385_v54  ;;  %1335 = vmatprep.subr.mxu1 %v385_v54 }
  0x80   : > { %431 = vmatpush1.msra.mxu0 %v384_v55  ;;  %1351 = vmatpush1.msra.mxu1 %v384_v55 }
  0x81   : > { %432 = vmatprep.subr.mxu0 %v383_v56  ;;  %1336 = vmatprep.subr.mxu1 %v383_v56 }
  0x82   : > { %433 = vmatpush1.msra.mxu0 %v382_v57  ;;  %1352 = vmatpush1.msra.mxu1 %v382_v57 }
  0x83   : > { %434 = vmatprep.subr.mxu0 %v381_v58  ;;  %1337 = vmatprep.subr.mxu1 %v381_v58 }
  0x84   : > { %435 = vmatpush1.msra.mxu0 %v380_v59  ;;  %1353 = vmatpush1.msra.mxu1 %v380_v59 }
  0x85   : > { %436 = vmatprep.subr.mxu0 %v379_v60  ;;  %1338 = vmatprep.subr.mxu1 %v379_v60 }
  0x86   : > { %437 = vmatpush1.msra.mxu0 %v378_v61  ;;  %1354 = vmatpush1.msra.mxu1 %v378_v61 }
  0x87   : > { %438 = vmatprep.subr.mxu0 %v377_v62  ;;  %1339 = vmatprep.subr.mxu1 %v377_v62 }
  0x88   : > { %439 = vmatpush1.msra.mxu0 %v376_v63  ;;  %1355 = vmatpush1.msra.mxu1 %v376_v63 }
  0x89   : > { %472 = vmatprep.mubr.f32.mxu0 %v1717_v2  ;;  %520 = vmatprep.mubr.f32.mxu1 %v1717_v2 }
  0x8a   : > { %473 = vmatmul.mubr.f32.vlgmr.msra.gmra.mxu0 %v360_v0  ;;  %521 = vmatmul.mubr.f32.vlgmr.msra.gmra.mxu1 %v368_v1 }
  0x8b   : > { %478 = vmatprep.mubr.f32.mxu0 %v1717_v2  ;;  %526 = vmatprep.mubr.f32.mxu1 %v1717_v2 }
  0x8e   : > { %479 = vmatmul.mubr.f32.gmra.mxu0 %v361_v3  ;;  %527 = vmatmul.mubr.f32.gmra.mxu1 %v369_v4 }
  0x8f   : > { %484 = vmatprep.mubr.f32.mxu0 %v1717_v2  ;;  %532 = vmatprep.mubr.f32.mxu1 %v1717_v2 }
  0x92   : > { %485 = vmatmul.mubr.f32.gmra.mxu0 %v362_v5  ;;  %533 = vmatmul.mubr.f32.gmra.mxu1 %v370_v6 }
  0x93   : > { %490 = vmatprep.mubr.f32.mxu0 %v1717_v2  ;;  %538 = vmatprep.mubr.f32.mxu1 %v1717_v2 }
  0x96   : > { %491 = vmatmul.mubr.f32.gmra.mxu0 %v363_v7  ;;  %539 = vmatmul.mubr.f32.gmra.mxu1 %v371_v8 }
  0x97   : > { %496 = vmatprep.mubr.f32.mxu0 %v1717_v2  ;;  %544 = vmatprep.mubr.f32.mxu1 %v1717_v2 }
  0x9a   : > { %497 = vmatmul.mubr.f32.gmra.mxu0 %v364_v9  ;;  %545 = vmatmul.mubr.f32.gmra.mxu1 %v372_v10 }
  0x9b   : > { %502 = vmatprep.mubr.f32.mxu0 %v1717_v2  ;;  %550 = vmatprep.mubr.f32.mxu1 %v1717_v2 }
  0x9e   : > { %503 = vmatmul.mubr.f32.gmra.mxu0 %v365_v11  ;;  %551 = vmatmul.mubr.f32.gmra.mxu1 %v373_v12 }
  0x9f   : > { %508 = vmatprep.mubr.f32.mxu0 %v1717_v2  ;;  %556 = vmatprep.mubr.f32.mxu1 %v1717_v2 }
  0xa2   : > { %509 = vmatmul.mubr.f32.gmra.mxu0 %v366_v13  ;;  %557 = vmatmul.mubr.f32.gmra.mxu1 %v374_v14 }
  0xa3   : > { %514 = vmatprep.mubr.f32.mxu0 %v1717_v2  ;;  %562 = vmatprep.mubr.f32.mxu1 %v1717_v2 }
  0xa6   : > { %515 = vmatmul.mubr.f32.gmra.mxu0 %v367_v15  ;;  %563 = vmatmul.mubr.f32.gmra.mxu1 %v375_v16 }
 0x14a   : > { %v474_v17 = vpop.f32.mrf.mxu0  ;;  %v522_v18 = vpop.f32.mrf.mxu1 }
 0x14b   : > { %569 = vst [vmem:[#allocation3 + $0xa8] sm:$0xff] %v474_v17  ;;  %585 = vst [vmem:[#allocation3 + $0xb8] sm:$0xff] %v522_v18 }
 0x14c   : > { %v476_v19 = vpop.f32.mrf.mxu0  ;;  %v524_v20 = vpop.f32.mrf.mxu1 }
 0x14d   : > { %570 = vst [vmem:[#allocation3 + $0x68] sm:$0xff] %v476_v19  ;;  %586 = vst [vmem:[#allocation3 + $0xd0] sm:$0xff] %v524_v20 }
 0x14e   : > { %v480_v21 = vpop.f32.mrf.mxu0  ;;  %v528_v22 = vpop.f32.mrf.mxu1 }
 0x14f   : > { %571 = vst [vmem:[#allocation3 + $0x10] sm:$0xff] %v480_v21  ;;  %587 = vst [vmem:[#allocation3 + $0xd8] sm:$0xff] %v528_v22 }
 0x150   : > { %v482_v23 = vpop.f32.mrf.mxu0  ;;  %v530_v24 = vpop.f32.mrf.mxu1 }
 0x151   : > { %572 = vst [vmem:[#allocation3 + $0xc0] sm:$0xff] %v482_v23  ;;  %588 = vst [vmem:[#allocation3 + $0x58] sm:$0xff] %v530_v24 }
 0x152   : > { %v486_v25 = vpop.f32.mrf.mxu0  ;;  %v534_v26 = vpop.f32.mrf.mxu1 }
 0x153   : > { %573 = vst [vmem:[#allocation3 + $0xc8] sm:$0xff] %v486_v25  ;;  %589 = vst [vmem:[#allocation3 + $0x80] sm:$0xff] %v534_v26 }
 0x154   : > { %v488_v27 = vpop.f32.mrf.mxu0  ;;  %v536_v28 = vpop.f32.mrf.mxu1 }
 0x155   : > { %574 = vst [vmem:[#allocation3 + $0xb0] sm:$0xff] %v488_v27  ;;  %590 = vst [vmem:[#allocation3 + $0x40] sm:$0xff] %v536_v28 }
 0x156   : > { %v492_v29 = vpop.f32.mrf.mxu0  ;;  %v540_v30 = vpop.f32.mrf.mxu1 }
 0x157   : > { %575 = vst [vmem:[#allocation3 + $0x70] sm:$0xff] %v492_v29  ;;  %591 = vst [vmem:[#allocation3 + $0x28] sm:$0xff] %v540_v30 }
 0x158   : > { %v494_v31 = vpop.f32.mrf.mxu0  ;;  %v542_v32 = vpop.f32.mrf.mxu1 }
 0x159   : > { %576 = vst [vmem:[#allocation3 + $0x38] sm:$0xff] %v494_v31  ;;  %592 = vst [vmem:[#allocation3] sm:$0xff] %v542_v32 }
 0x15a   : > { %v498_v33 = vpop.f32.mrf.mxu0  ;;  %v546_v34 = vpop.f32.mrf.mxu1 }
 0x15b   : > { %577 = vst [vmem:[#allocation3 + $0x48] sm:$0xff] %v498_v33  ;;  %593 = vst [vmem:[#allocation3 + $0x90] sm:$0xff] %v546_v34 }
 0x15c   : > { %v500_v35 = vpop.f32.mrf.mxu0  ;;  %v548_v36 = vpop.f32.mrf.mxu1 }
 0x15d   : > { %578 = vst [vmem:[#allocation3 + $0xf8] sm:$0xff] %v500_v35  ;;  %594 = vst [vmem:[#allocation3 + $0xe8] sm:$0xff] %v548_v36 }
 0x15e   : > { %v504_v37 = vpop.f32.mrf.mxu0  ;;  %v552_v38 = vpop.f32.mrf.mxu1 }
 0x15f   : > { %579 = vst [vmem:[#allocation3 + $0x78] sm:$0xff] %v504_v37  ;;  %595 = vst [vmem:[#allocation3 + $0xa0] sm:$0xff] %v552_v38 }
 0x160   : > { %v506_v39 = vpop.f32.mrf.mxu0  ;;  %v554_v40 = vpop.f32.mrf.mxu1 }
 0x161   : > { %580 = vst [vmem:[#allocation3 + $0x88] sm:$0xff] %v506_v39  ;;  %596 = vst [vmem:[#allocation3 + $0x20] sm:$0xff] %v554_v40 }
 0x162   : > { %v510_v41 = vpop.f32.mrf.mxu0  ;;  %v558_v42 = vpop.f32.mrf.mxu1 }
 0x163   : > { %581 = vst [vmem:[#allocation3 + $0xf0] sm:$0xff] %v510_v41  ;;  %597 = vst [vmem:[#allocation3 + $0x8] sm:$0xff] %v558_v42 }
 0x164   : > { %v512_v43 = vpop.f32.mrf.mxu0  ;;  %v560_v44 = vpop.f32.mrf.mxu1 }
 0x165   : > { %582 = vst [vmem:[#allocation3 + $0x18] sm:$0xff] %v512_v43  ;;  %598 = vst [vmem:[#allocation3 + $0xe0] sm:$0xff] %v560_v44 }
 0x166   : > { %v516_v45 = vpop.f32.mrf.mxu0  ;;  %v564_v46 = vpop.f32.mrf.mxu1 }
 0x167   : > { %583 = vst [vmem:[#allocation3 + $0x30] sm:$0xff] %v516_v45  ;;  %599 = vst [vmem:[#allocation3 + $0x60] sm:$0xff] %v564_v46 }
 0x168   : > { %v518_v47 = vpop.f32.mrf.mxu0  ;;  %v566_v48 = vpop.f32.mrf.mxu1 }
 0x169   : > { %584 = vst [vmem:[#allocation3 + $0x50] sm:$0xff] %v518_v47  ;;  %600 = vst [vmem:[#allocation3 + $0x98] sm:$0xff] %v566_v48 }
 0x16a PF: > { %v672_v50 = vld [vmem:[#allocation3 + $0x8] sm:$0xff]  ;;  %v671_v51 = vld [vmem:[#allocation3 + $0xa0] sm:$0xff]  ;;  %v670_v52 = vld [vmem:[#allocation3 + $0x90] sm:$0xff]  ;;  %p1213_p6 = scmp.ge.s32.totalorder %s1700_s18, 2 }
 0x16b   : > { %v669_v53 = vld [vmem:[#allocation3 + $0x28] sm:$0xff]  ;;  %v668_v54 = vld [vmem:[#allocation3 + $0x80] sm:$0xff]  ;;  %v667_v55 = vld [vmem:[#allocation3 + $0xd8] sm:$0xff] }
 0x16c   : > { %v666_v56 = vld [vmem:[#allocation3 + $0xb8] sm:$0xff]  ;;  %v664_v58 = vld [vmem:[#allocation3 + $0xf0] sm:$0xff]  ;;  %v662_v60 = vld [vmem:[#allocation3 + $0x48] sm:$0xff] }
 0x16d   : > { %v663_v59 = vld [vmem:[#allocation3 + $0x78] sm:$0xff]  ;;  %v661_v61 = vld [vmem:[#allocation3 + $0x70] sm:$0xff]  ;;  %v660_v62 = vld [vmem:[#allocation3 + $0xc8] sm:$0xff] }
 0x16e   : > { %v673_v49 = vld [vmem:[#allocation3 + $0x60] sm:$0xff]  ;;  %v665_v57 = vld [vmem:[#allocation3 + $0x30] sm:$0xff]  ;;  %v658_v0 = vld [vmem:[#allocation3 + $0xa8] sm:$0xff] }
 0x16f   : > { %1268 = vmatprep.subr.mxu0 %v673_v49  ;;  %1356 = vmatprep.subr.mxu1 %v673_v49  ;;  %v659_v63 = vld [vmem:[#allocation3 + $0x10] sm:$0xff]  ;;  %v637_v1 = vld [vmem:[#allocation5] sm:$0xff]  ;;  %v638_v3 = vld [vmem:[#allocation5 + $0x8] sm:$0xff] }
 0x170   : > { %1269 = vmatpush3.msra.mxu0 %v673_v49  ;;  %1372 = vmatpush3.msra.mxu1 %v673_v49  ;;  %v645_v2 = vld [vmem:[#allocation5 + $0x40] sm:$0xff]  ;;  %v646_v4 = vld [vmem:[#allocation5 + $0x48] sm:$0xff]  ;;  %v639_v5 = vld [vmem:[#allocation5 + $0x10] sm:$0xff] }
 0x171   : > { %1270 = vmatprep.subr.mxu0 %v672_v50  ;;  %1357 = vmatprep.subr.mxu1 %v672_v50  ;;  %v647_v6 = vld [vmem:[#allocation5 + $0x50] sm:$0xff]  ;;  %v640_v7 = vld [vmem:[#allocation5 + $0x18] sm:$0xff]  ;;  %v641_v9 = vld [vmem:[#allocation5 + $0x20] sm:$0xff] }
 0x172   : > { %1271 = vmatpush3.msra.mxu0 %v672_v50  ;;  %1373 = vmatpush3.msra.mxu1 %v672_v50  ;;  %v648_v8 = vld [vmem:[#allocation5 + $0x58] sm:$0xff]  ;;  %v649_v10 = vld [vmem:[#allocation5 + $0x60] sm:$0xff]  ;;  %v642_v11 = vld [vmem:[#allocation5 + $0x28] sm:$0xff] }
 0x173   : > { %1272 = vmatprep.subr.mxu0 %v671_v51  ;;  %1358 = vmatprep.subr.mxu1 %v671_v51  ;;  %v650_v12 = vld [vmem:[#allocation5 + $0x68] sm:$0xff]  ;;  %v643_v13 = vld [vmem:[#allocation5 + $0x30] sm:$0xff]  ;;  %v644_v15 = vld [vmem:[#allocation5 + $0x38] sm:$0xff] }
 0x174   : > { %1273 = vmatpush3.msra.mxu0 %v671_v51  ;;  %1374 = vmatpush3.msra.mxu1 %v671_v51  ;;  %v651_v14 = vld [vmem:[#allocation5 + $0x70] sm:$0xff]  ;;  %v652_v16 = vld [vmem:[#allocation5 + $0x78] sm:$0xff]  ;;  %v877_v17 = vld [vmem:[#allocation3 + $0xc0] sm:$0xff] }
 0x175   : > { %1274 = vmatprep.subr.mxu0 %v670_v52  ;;  %1359 = vmatprep.subr.mxu1 %v670_v52  ;;  %v885_v18 = vld [vmem:[#allocation3 + $0x58] sm:$0xff]  ;;  %v1212_v20 = vld [vmem:[%s280_s6] ss:$0 sm:$0xff]  ;;  %v876_v22 = vld [vmem:[#allocation3 + $0x68] sm:$0xff] }
 0x176   : > { %1275 = vmatpush3.msra.mxu0 %v670_v52  ;;  %1375 = vmatpush3.msra.mxu1 %v670_v52  ;;  %v884_v23 = vld [vmem:[#allocation3 + $0xd0] sm:$0xff]  ;;  %v879_v28 = vld [vmem:[#allocation3 + $0x38] sm:$0xff]  ;;  %v887_v29 = vld [vmem:[#allocation3] sm:$0xff] }
 0x177   : > { %1276 = vmatprep.subr.mxu0 %v669_v53  ;;  %1360 = vmatprep.subr.mxu1 %v669_v53  ;;  %v878_v36 = vld [vmem:[#allocation3 + $0xb0] sm:$0xff]  ;;  %v886_v37 = vld [vmem:[#allocation3 + $0x40] sm:$0xff]  ;;  %v881_v44 = vld [vmem:[#allocation3 + $0x88] sm:$0xff] }
 0x178   : > { %1277 = vmatpush3.msra.mxu0 %v669_v53  ;;  %1376 = vmatpush3.msra.mxu1 %v669_v53  ;;  %v889_v45 = vld [vmem:[#allocation3 + $0x20] sm:$0xff]  ;;  %v880_v52 = vld [vmem:[#allocation3 + $0xf8] sm:$0xff]  ;;  %v888_v53 = vld [vmem:[#allocation3 + $0xe8] sm:$0xff] }
 0x179   : > { %1278 = vmatprep.subr.mxu0 %v668_v54  ;;  %1361 = vmatprep.subr.mxu1 %v668_v54 }
 0x17a   : > { %1279 = vmatpush3.msra.mxu0 %v668_v54  ;;  %1377 = vmatpush3.msra.mxu1 %v668_v54 }
 0x17b   : > { %1280 = vmatprep.subr.mxu0 %v667_v55  ;;  %1362 = vmatprep.subr.mxu1 %v667_v55 }
 0x17c   : > { %1281 = vmatpush3.msra.mxu0 %v667_v55  ;;  %1378 = vmatpush3.msra.mxu1 %v667_v55 }
 0x17d   : > { %1282 = vmatprep.subr.mxu0 %v666_v56  ;;  %1363 = vmatprep.subr.mxu1 %v666_v56 }
 0x17e   : > { %1283 = vmatpush3.msra.mxu0 %v666_v56  ;;  %1379 = vmatpush3.msra.mxu1 %v666_v56 }
 0x17f   : > { %1284 = vmatprep.subr.mxu0 %v665_v57  ;;  %1364 = vmatprep.subr.mxu1 %v665_v57 }
 0x180   : > { %1285 = vmatpush3.msra.mxu0 %v665_v57  ;;  %1380 = vmatpush3.msra.mxu1 %v665_v57 }
 0x181   : > { %1286 = vmatprep.subr.mxu0 %v664_v58  ;;  %1365 = vmatprep.subr.mxu1 %v664_v58 }
 0x182   : > { %1287 = vmatpush3.msra.mxu0 %v664_v58  ;;  %1381 = vmatpush3.msra.mxu1 %v664_v58 }
 0x183   : > { %1288 = vmatprep.subr.mxu0 %v663_v59  ;;  %1366 = vmatprep.subr.mxu1 %v663_v59 }
 0x184   : > { %1289 = vmatpush3.msra.mxu0 %v663_v59  ;;  %1382 = vmatpush3.msra.mxu1 %v663_v59 }
 0x185   : > { %1290 = vmatprep.subr.mxu0 %v662_v60  ;;  %1367 = vmatprep.subr.mxu1 %v662_v60 }
 0x186   : > { %1291 = vmatpush3.msra.mxu0 %v662_v60  ;;  %1383 = vmatpush3.msra.mxu1 %v662_v60  ;;  %v883_v60 = vld [vmem:[#allocation3 + $0x50] sm:$0xff] }
 0x187   : > { %1292 = vmatprep.subr.mxu0 %v661_v61  ;;  %1368 = vmatprep.subr.mxu1 %v661_v61 }
 0x188   : > { %1293 = vmatpush3.msra.mxu0 %v661_v61  ;;  %1384 = vmatpush3.msra.mxu1 %v661_v61  ;;  %v891_v61 = vld [vmem:[#allocation3 + $0x98] sm:$0xff] }
 0x189   : > { %1294 = vmatprep.subr.mxu0 %v660_v62  ;;  %1369 = vmatprep.subr.mxu1 %v660_v62 }
 0x18a   : > { %1295 = vmatpush3.msra.mxu0 %v660_v62  ;;  %1385 = vmatpush3.msra.mxu1 %v660_v62 }
 0x18b   : > { %1296 = vmatprep.subr.mxu0 %v659_v63  ;;  %1370 = vmatprep.subr.mxu1 %v659_v63 }
 0x18c   : > { %1297 = vmatpush3.msra.mxu0 %v659_v63  ;;  %1386 = vmatpush3.msra.mxu1 %v659_v63 }
 0x18d   : > { %1298 = vmatprep.subr.mxu0 %v658_v0  ;;  %1371 = vmatprep.subr.mxu1 %v658_v0 }
 0x18e   : > { %1299 = vmatpush3.msra.mxu0 %v658_v0  ;;  %1387 = vmatpush3.msra.mxu1 %v658_v0 }
 0x18f   : > { %1300 = vmatprep.mubr.f32.mxu0 %v637_v1  ;;  %1312 = vmatprep.mubr.f32.mxu1 %v645_v2 }
 0x190   : > { %1301 = vmatmul.mubr.f32.vlgmr.msra.gmra.mxu0 %v638_v3  ;;  %1313 = vmatmul.mubr.f32.vlgmr.msra.gmra.mxu1 %v646_v4  ;;  %v882_v4 = vld [vmem:[#allocation3 + $0x18] sm:$0xff] }
 0x191   : > { %1303 = vmatprep.mubr.f32.mxu0 %v639_v5  ;;  %1315 = vmatprep.mubr.f32.mxu1 %v647_v6  ;;  %v890_v5 = vld [vmem:[#allocation3 + $0xe0] sm:$0xff] }
 0x194   : > { %1304 = vmatmul.mubr.f32.gmra.mxu0 %v640_v7  ;;  %1316 = vmatmul.mubr.f32.gmra.mxu1 %v648_v8 }
 0x195   : > { %1306 = vmatprep.mubr.f32.mxu0 %v641_v9  ;;  %1318 = vmatprep.mubr.f32.mxu1 %v649_v10 }
 0x198   : > { %1307 = vmatmul.mubr.f32.gmra.mxu0 %v642_v11  ;;  %1319 = vmatmul.mubr.f32.gmra.mxu1 %v650_v12 }
 0x199   : > { %1309 = vmatprep.mubr.f32.mxu0 %v643_v13  ;;  %1321 = vmatprep.mubr.f32.mxu1 %v651_v14 }
 0x19c   : > { %1310 = vmatmul.mubr.f32.gmra.mxu0 %v644_v15  ;;  %1322 = vmatmul.mubr.f32.gmra.mxu1 %v652_v16 }
 0x250   : > { %v1302_v19 = vpop.f32.mrf.mxu0  ;;  %v1314_v21 = vpop.f32.mrf.mxu1 }
 0x251   : > { %v893_v24 = vadd.f32 %v1302_v19, %v877_v17  ;;  %v901_v25 = vadd.f32 %v1314_v21, %v885_v18 }
 0x252   : > { %v740_v26 = vpop.f32.mrf.mxu0  ;;  %v780_v27 = vpop.f32.mrf.mxu1 }
 0x253   : > { %v1923_v30 = vadd.f32 %v1212_v20, %v893_v24  ;;  %v1925_v31 = vadd.f32 %v1212_v20, %v901_v25  ;;  %v892_v32 = vadd.f32 %v876_v22, %v740_v26  ;;  %v900_v33 = vadd.f32 %v884_v23, %v780_v27 }
 0x254   : > { %v1305_v34 = vpop.f32.mrf.mxu0  ;;  %v1317_v35 = vpop.f32.mrf.mxu1 }
 0x255   : > { %v1927_v38 = vadd.f32 %v1212_v20, %v892_v32  ;;  %v1929_v39 = vadd.f32 %v1212_v20, %v900_v33  ;;  %v895_v40 = vadd.f32 %v1305_v34, %v879_v28  ;;  %v903_v41 = vadd.f32 %v1317_v35, %v887_v29 }
 0x256   : > { %v750_v42 = vpop.f32.mrf.mxu0  ;;  %v790_v43 = vpop.f32.mrf.mxu1 }
 0x257   : > { %v1931_v46 = vadd.f32 %v1212_v20, %v895_v40  ;;  %v1933_v47 = vadd.f32 %v1212_v20, %v903_v41  ;;  %v894_v48 = vadd.f32 %v878_v36, %v750_v42  ;;  %v902_v49 = vadd.f32 %v886_v37, %v790_v43 }
 0x258   : > { %v1308_v50 = vpop.f32.mrf.mxu0  ;;  %v1320_v51 = vpop.f32.mrf.mxu1 }
 0x259   : > { %v1935_v54 = vadd.f32 %v1212_v20, %v894_v48  ;;  %v1937_v55 = vadd.f32 %v1212_v20, %v902_v49  ;;  %v897_v56 = vadd.f32 %v1308_v50, %v881_v44  ;;  %v905_v57 = vadd.f32 %v1320_v51, %v889_v45 }
 0x25a   : > { %v760_v58 = vpop.f32.mrf.mxu0  ;;  %v800_v59 = vpop.f32.mrf.mxu1 }
 0x25b   : > { %v1939_v62 = vadd.f32 %v1212_v20, %v897_v56  ;;  %v1941_v63 = vadd.f32 %v1212_v20, %v905_v57  ;;  %v896_v0 = vadd.f32 %v880_v52, %v760_v58  ;;  %v904_v1 = vadd.f32 %v888_v53, %v800_v59 }
 0x25c   : > { %v1311_v2 = vpop.f32.mrf.mxu0  ;;  %v1323_v3 = vpop.f32.mrf.mxu1 }
 0x25d   : > { %v919_v6 = vadd.f32 %v1212_v20, %v896_v0  ;;  %v1943_v7 = vadd.f32 %v1212_v20, %v904_v1  ;;  %v899_v8 = vadd.f32 %v1311_v2, %v883_v60  ;;  %v907_v9 = vadd.f32 %v1323_v3, %v891_v61  ;;  %934 = sbr.rel (%p1213_p6) target bundleno = 620 (0x26c), region = 72 }
 0x25e   : > { %v770_v10 = vpop.f32.mrf.mxu0  ;;  %v810_v11 = vpop.f32.mrf.mxu1 }
 0x25f   : > { %v922_v12 = vadd.f32 %v1212_v20, %v899_v8  ;;  %v1945_v13 = vadd.f32 %v1212_v20, %v907_v9  ;;  %v898_v14 = vadd.f32 %v882_v4, %v770_v10  ;;  %v906_v15 = vadd.f32 %v890_v5, %v810_v11 }
 0x261   : > { %v921_v16 = vadd.f32 %v1212_v20, %v898_v14  ;;  %v929_v17 = vadd.f32 %v1212_v20, %v906_v15 }
 0x262   : > { %v935_v18 = vmax.f32 %v1927_v38, 0.0  ;;  %v936_v19 = vmax.f32 %v1923_v30, 0.0  ;;  %v937_v21 = vmax.f32 %v1935_v54, 0.0  ;;  %v938_v22 = vmax.f32 %v1931_v46, 0.0 }
 0x263   : > { %v939_v23 = vmax.f32 %v919_v6, 0.0  ;;  %v940_v24 = vmax.f32 %v1939_v62, 0.0  ;;  %v941_v25 = vmax.f32 %v921_v16, 0.0  ;;  %v942_v26 = vmax.f32 %v922_v12, 0.0 }
 0x264   : > { %952 = vst [vmem:[#allocation2 + $0x30] sm:$0xff] %v935_v18  ;;  %953 = vst [vmem:[#allocation2] sm:$0xff] %v936_v19  ;;  %v943_v20 = vmax.f32 %v1929_v39, 0.0  ;;  %v944_v27 = vmax.f32 %v1925_v31, 0.0  ;;  %v945_v28 = vmax.f32 %v1937_v55, 0.0  ;;  %v946_v29 = vmax.f32 %v1933_v47, 0.0 }
 0x265   : > { %954 = vst [vmem:[#allocation2 + $0x58] sm:$0xff] %v937_v21  ;;  %955 = vst [vmem:[#allocation2 + $0x18] sm:$0xff] %v938_v22  ;;  %v947_v32 = vmax.f32 %v1943_v7, 0.0  ;;  %v948_v33 = vmax.f32 %v1941_v63, 0.0  ;;  %v949_v34 = vmax.f32 %v929_v17, 0.0  ;;  %v950_v35 = vmax.f32 %v1945_v13, 0.0 }
 0x266   : > { %956 = vst [vmem:[#allocation2 + $0x50] sm:$0xff] %v939_v23  ;;  %957 = vst [vmem:[#allocation2 + $0x68] sm:$0xff] %v940_v24 }
 0x267   : > { %958 = vst [vmem:[#allocation2 + $0x8] sm:$0xff] %v941_v25  ;;  %959 = vst [vmem:[#allocation2 + $0x48] sm:$0xff] %v942_v26 }
 0x268   : > { %960 = vst [vmem:[#allocation2 + $0x40] sm:$0xff] %v943_v20  ;;  %961 = vst [vmem:[#allocation2 + $0x20] sm:$0xff] %v944_v27 }
 0x269   : > { %962 = vst [vmem:[#allocation2 + $0x10] sm:$0xff] %v945_v28  ;;  %963 = vst [vmem:[#allocation2 + $0x38] sm:$0xff] %v946_v29 }
 0x26a   : > { %964 = vst [vmem:[#allocation2 + $0x60] sm:$0xff] %v947_v32  ;;  %965 = vst [vmem:[#allocation2 + $0x70] sm:$0xff] %v948_v33 }
 0x26b   : > { %966 = vst [vmem:[#allocation2 + $0x78] sm:$0xff] %v949_v34  ;;  %967 = vst [vmem:[#allocation2 + $0x28] sm:$0xff] %v950_v35 }
 0x26c PF: > { %p1214_p5 = scmp.ne.s32.totalorder %s1700_s18, 2 }
 0x26e   : > { %971 = sbr.rel (%p1214_p5) target bundleno = 675 (0x2a3), region = 76 }
 0x273   : > { %v1215_v36 = vmul.f32 -1.442695, %v1927_v38  ;;  %v1216_v37 = vmul.f32 -1.442695, %v1923_v30  ;;  %v1217_v40 = vmul.f32 -1.442695, %v1935_v54 }
 0x274   : > { %v1218_v41 = vmul.f32 -1.442695, %v1931_v46  ;;  %v1219_v42 = vmul.f32 -1.442695, %v919_v6  ;;  %v1220_v43 = vmul.f32 -1.442695, %v1939_v62 }
 0x275   : > { %1478 = vpow2.f32 %v1215_v36  ;;  %v1221_v44 = vmul.f32 -1.442695, %v921_v16  ;;  %v1222_v45 = vmul.f32 -1.442695, %v922_v12  ;;  %v1223_v48 = vmul.f32 -1.442695, %v1929_v39 }
 0x276   : > { %1480 = vpow2.f32 %v1216_v37  ;;  %v1224_v38 = vmul.f32 -1.442695, %v1925_v31  ;;  %v1225_v30 = vmul.f32 -1.442695, %v1937_v55  ;;  %v1226_v46 = vmul.f32 -1.442695, %v1933_v47 }
 0x277   : > { %1482 = vpow2.f32 %v1217_v40  ;;  %v1227_v49 = vmul.f32 -1.442695, %v1943_v7  ;;  %v1228_v50 = vmul.f32 -1.442695, %v1941_v63  ;;  %v1229_v51 = vmul.f32 -1.442695, %v929_v17 }
 0x278   : > { %1484 = vpow2.f32 %v1218_v41  ;;  %v1230_v39 = vmul.f32 -1.442695, %v1945_v13 }
 0x279   : > { %1486 = vpow2.f32 %v1219_v42 }
 0x27a   : > { %1488 = vpow2.f32 %v1220_v43 }
 0x27b   : > { %1490 = vpow2.f32 %v1221_v44 }
 0x27c   : > { %1492 = vpow2.f32 %v1222_v45 }
 0x27d   : > { %1494 = vpow2.f32 %v1223_v48 }
 0x27e   : > { %1496 = vpow2.f32 %v1224_v38 }
 0x27f   : > { %1498 = vpow2.f32 %v1225_v30 }
 0x280   : > { %1500 = vpow2.f32 %v1226_v46 }
 0x281   : > { %1502 = vpow2.f32 %v1227_v49 }
 0x282   : > { %v1479_v52 = vpop.eup %1478  ;;  %1504 = vpow2.f32 %v1228_v50 }
 0x283   : > { %v1481_v31 = vpop.eup %1480  ;;  %v1020_v53 = vadd.f32 1.0, %v1479_v52  ;;  %1506 = vpow2.f32 %v1229_v51 }
 0x284   : > { %v1483_v54 = vpop.eup %1482  ;;  %v1021_v55 = vadd.f32 1.0, %v1481_v31  ;;  %1508 = vpow2.f32 %v1230_v39 }
 0x285   : > { %v1485_v47 = vpop.eup %1484  ;;  %1510 = vrcp.f32 %v1020_v53  ;;  %v1022_v56 = vadd.f32 1.0, %v1483_v54 }
 0x286   : > { %v1487_v57 = vpop.eup %1486  ;;  %1512 = vrcp.f32 %v1021_v55  ;;  %v1023_v58 = vadd.f32 1.0, %v1485_v47 }
 0x287   : > { %v1489_v59 = vpop.eup %1488  ;;  %1514 = vrcp.f32 %v1022_v56  ;;  %v1024_v60 = vadd.f32 1.0, %v1487_v57 }
 0x288   : > { %v1491_v61 = vpop.eup %1490  ;;  %1516 = vrcp.f32 %v1023_v58  ;;  %v1025_v62 = vadd.f32 1.0, %v1489_v59 }
 0x289   : > { %v1493_v63 = vpop.eup %1492  ;;  %1518 = vrcp.f32 %v1024_v60  ;;  %v1026_v0 = vadd.f32 1.0, %v1491_v61 }
 0x28a   : > { %v1495_v1 = vpop.eup %1494  ;;  %1520 = vrcp.f32 %v1025_v62  ;;  %v1027_v2 = vadd.f32 1.0, %v1493_v63 }
 0x28b   : > { %v1497_v3 = vpop.eup %1496  ;;  %1522 = vrcp.f32 %v1026_v0  ;;  %v1028_v4 = vadd.f32 1.0, %v1495_v1 }
 0x28c   : > { %v1499_v5 = vpop.eup %1498  ;;  %1524 = vrcp.f32 %v1027_v2  ;;  %v1029_v6 = vadd.f32 1.0, %v1497_v3 }
 0x28d   : > { %v1501_v7 = vpop.eup %1500  ;;  %1526 = vrcp.f32 %v1028_v4  ;;  %v1030_v8 = vadd.f32 1.0, %v1499_v5 }
 0x28e   : > { %v1503_v9 = vpop.eup %1502  ;;  %1528 = vrcp.f32 %v1029_v6  ;;  %v1031_v10 = vadd.f32 1.0, %v1501_v7 }
 0x28f   : > { %v1505_v11 = vpop.eup %1504  ;;  %1530 = vrcp.f32 %v1030_v8  ;;  %v1032_v12 = vadd.f32 1.0, %v1503_v9 }
 0x290   : > { %v1507_v13 = vpop.eup %1506  ;;  %1532 = vrcp.f32 %v1031_v10  ;;  %v1033_v14 = vadd.f32 1.0, %v1505_v11 }
 0x291   : > { %v1509_v15 = vpop.eup %1508  ;;  %1534 = vrcp.f32 %v1032_v12  ;;  %v1034_v16 = vadd.f32 1.0, %v1507_v13 }
 0x292   : > { %v1511_v17 = vpop.eup %1510  ;;  %1536 = vrcp.f32 %v1033_v14  ;;  %v1035_v18 = vadd.f32 1.0, %v1509_v15 }
 0x293   : > { %v1513_v19 = vpop.eup %1512  ;;  %1068 = vst [vmem:[#allocation11] sm:$0xff] %v1511_v17  ;;  %1538 = vrcp.f32 %v1034_v16 }
 0x294   : > { %v1515_v21 = vpop.eup %1514  ;;  %1069 = vst [vmem:[#allocation11 + $0x8] sm:$0xff] %v1513_v19  ;;  %1540 = vrcp.f32 %v1035_v18 }
 0x295   : > { %v1517_v22 = vpop.eup %1516  ;;  %1070 = vst [vmem:[#allocation11 + $0x10] sm:$0xff] %v1515_v21 }
 0x296   : > { %v1519_v23 = vpop.eup %1518  ;;  %1071 = vst [vmem:[#allocation11 + $0x18] sm:$0xff] %v1517_v22 }
 0x297   : > { %v1521_v24 = vpop.eup %1520  ;;  %1072 = vst [vmem:[#allocation11 + $0x20] sm:$0xff] %v1519_v23 }
 0x298   : > { %v1523_v25 = vpop.eup %1522  ;;  %1073 = vst [vmem:[#allocation11 + $0x28] sm:$0xff] %v1521_v24 }
 0x299   : > { %v1525_v26 = vpop.eup %1524  ;;  %1074 = vst [vmem:[#allocation11 + $0x30] sm:$0xff] %v1523_v25 }
 0x29a   : > { %v1527_v20 = vpop.eup %1526  ;;  %1075 = vst [vmem:[#allocation11 + $0x38] sm:$0xff] %v1525_v26 }
 0x29b   : > { %v1529_v27 = vpop.eup %1528  ;;  %1076 = vst [vmem:[#allocation11 + $0x40] sm:$0xff] %v1527_v20 }
 0x29c   : > { %v1531_v28 = vpop.eup %1530  ;;  %1077 = vst [vmem:[#allocation11 + $0x48] sm:$0xff] %v1529_v27 }
 0x29d   : > { %v1533_v29 = vpop.eup %1532  ;;  %1078 = vst [vmem:[#allocation11 + $0x50] sm:$0xff] %v1531_v28 }
 0x29e   : > { %v1535_v32 = vpop.eup %1534  ;;  %1079 = vst [vmem:[#allocation11 + $0x58] sm:$0xff] %v1533_v29 }
 0x29f   : > { %v1537_v33 = vpop.eup %1536  ;;  %1080 = vst [vmem:[#allocation11 + $0x60] sm:$0xff] %v1535_v32 }
 0x2a0   : > { %v1539_v34 = vpop.eup %1538  ;;  %1081 = vst [vmem:[#allocation11 + $0x68] sm:$0xff] %v1537_v33 }
 0x2a1   : > { %v1541_v35 = vpop.eup %1540  ;;  %1082 = vst [vmem:[#allocation11 + $0x70] sm:$0xff] %v1539_v34 }
 0x2a2   : > { %1083 = vst [vmem:[#allocation11 + $0x78] sm:$0xff] %v1541_v35 }
 0x2a3 PF: > { %p1418_p11 = scmp.eq.s32.totalorder %s1775_s21, 2  ;;  %s1718_s18 = smov [#allocation11]  }
 0x2a4   : > { %s1093_s9 = sshll.u32 %s1718_s18, 4  ;;  %s1094_s9 = int_to_ptr.vmem [resolvable:$true] %s1093_s9 }
 0x2a5   : > { %s1622_s8 = scalar_lea.vmem %s1094_s9, 2048  ;;  %p1629_p2 = scmp.lt.s32.totalorder %s1094_s9, %s1094_s9 }
 0x2a6   : > { %p1623_p0 = scmp.ne.s32.totalorder %s1094_s9, %s1622_s8  ;;  %p1630_p4 = scmp.lt.s32.totalorder %s1622_s8, %s1622_s8 }
 0x2a8   : > { %p1624_p1 = pnand %p1623_p0, %p1418_p11  ;;  %p1631_p13 = por %p1630_p4, %p1629_p2 }
 0x2aa   : > { %p1625_p3 = pneg %p1624_p1 }
 0x2ac   : > { %p1632_p10 = pnand %p1631_p13, %p1625_p3 }
 0x2ae   : > { %1635 = shalt.err (!%p1632_p10)
}
 0x2af   : > { %s1719_s12 = smov 128   ;;  %s1720_s13 = smov 8  }
 0x2b0   : > { %1399 = dma.vmem_to_hbm [thread:$0]  (%p1418_p11), %s1094_s9, 2048, %s2007_s4, [#allocation7], %s1719_s12, %s1719_s12, %s1720_s13  }
 0x2b1   : > { %1683 = dma.done.wait (%p1418_p11), [#allocation7], 2048  }
 0x2b2   : > { %1685 = vsyncadd (%p1418_p11), [#allocation7], 4294965248 }
 0x2b3 PF: > { %s17_s20 = sadd.s32 1, %s1708_s20   ;;  %s2019_s15 = smov %s1692_s16 }
 0x2b4   : > { %p14_p9 = scmp.ge.s32.totalorder %s17_s20, 5   ;;  %s2020_s16 = smov %s1696_s17 }
 0x2b5   : > { %s2021_s17 = smov %s1856_s28  ;;  %s2022_s18 = smov %s1704_s19 }
 0x2b6   : > { %s2023_s19 = smov %s2025_s24  ;;  %16 = sbr.rel (!%p14_p9) target bundleno = 5 (0x5), region = 116 }
 0x2bb   :  { %1109 = vsyncpa [#allocation6], 1 }
 0x2bc   :  { %1111 = vsyncpa [#allocation6 + $0x1], 1 }
 0x2bd   :  { %1112 = vsyncpa [#allocation9], 1 }
 0x2be   :  { %1113 = vsyncpa [#allocation7], 1 }
 0x2bf   :  { %1115 = vsyncpa [#allocation7 + $0x1], 1 }

</bundles_post_ra>
